<compile_context>
chip_gen: v6e
topology: v6e:2x2x1
jax: 0.10.0
libtpu: 0.0.40
codegen_flags: <defaults>
</compile_context>

<pallas_src>
import math
import functools

import jax
import jax.numpy as jnp
from jax import lax
from jax.experimental import pallas as pl
from jax.experimental.pallas import tpu as pltpu


def _round_up(x, m):
    return ((x + m - 1) // m) * m


def chunk_detector_kernel(ctx_ref, sen_ref, w_ref, b_ref, out_ref, *, H, inv_sqrt_h):
    # ctx/sen: [TILE_B, D]   w: [D, 3H] ([Wp | Ws | Wv])   b: [1, 3H]
    w = w_ref[...].astype(jnp.float32)
    b = b_ref[...].astype(jnp.float32)
    ctx = ctx_ref[...].astype(jnp.float32)
    sen = sen_ref[...].astype(jnp.float32)

    # Two MXU matmuls against the resident fused weight (all 3 projections).
    # Default matmul precision matches the plain-JAX/XLA reference.
    z_ctx = jnp.dot(ctx, w, preferred_element_type=jnp.float32) + b   # [TILE_B, 3H]
    z_sen = jnp.dot(sen, w, preferred_element_type=jnp.float32) + b   # [TILE_B, 3H]

    # Activations (f32 on VPU/EUP -- v5e-safe). Slices land on 128-lane tiles.
    pot_ctx = jax.nn.sigmoid(z_ctx[:, 0:H])            # Potency(context)
    pot_sen = jax.nn.sigmoid(z_sen[:, 0:H])            # Potency(sentence)
    sgn_ctx = jnp.tanh(z_ctx[:, H:2 * H])              # Sign(context)
    sgn_sen = jnp.tanh(z_sen[:, H:2 * H])              # Sign(sentence)
    val_ctx = jnp.maximum(z_ctx[:, 2 * H:3 * H], 0.0)  # Value(context)
    val_sen = jnp.maximum(z_sen[:, 2 * H:3 * H], 0.0)  # Value(sentence)

    ck = pot_sen * sgn_ctx + val_ctx                   # context_key  [TILE_B, H]
    sk = pot_ctx * sgn_sen + val_sen                   # sentence_key [TILE_B, H]

    # Put batch on lanes so the reductions yield a lane-dense (1, TILE_B) row
    # (unmasked vst on the output path).  The 128-aligned transposes and the
    # sublane reductions ride the otherwise-idle XLU slot.
    ck_t = ck.T                                        # [H, TILE_B]
    sk_t = sk.T                                        # [H, TILE_B]

    raw    = jnp.sum(ck_t * sk_t, axis=0, keepdims=True)   # (1, TILE_B)
    ssq_ck = jnp.sum(ck_t * ck_t, axis=0, keepdims=True)
    ssq_sk = jnp.sum(sk_t * sk_t, axis=0, keepdims=True)

    # normalize(ck) . normalize(sk) == rowdot(ck, sk) * rsqrt * rsqrt
    # (max(ssq, 1e-24) == max(||x||, 1e-12)^2, matching F.normalize's eps).
    sim = (raw
           * lax.rsqrt(jnp.maximum(ssq_ck, 1e-24))
           * lax.rsqrt(jnp.maximum(ssq_sk, 1e-24))
           * inv_sqrt_h)
    out_ref[...] = jax.nn.sigmoid(sim)                 # (1, TILE_B), lane-dense


def fuse_params(params):
    """Call ONCE at setup time (outside the hot path): fuse the 3 Linears."""
    w = jnp.concatenate([params["wp"], params["ws"], params["wv"]], axis=1)  # [D, 3H]
    b = jnp.concatenate([params["bp"], params["bs"], params["bv"]], axis=1)  # [1, 3H]
    return w, b


def chunk_detector_forward(context, sentence, w_fused, b_fused, *, max_tile_b=512):
    """context, sentence: [B, D] float32. Returns similarity: [B] float32."""
    B, D = context.shape
    D_w, H3 = w_fused.shape
    assert D_w == D
    H = H3 // 3
    # TODO(synk): kernel assumes hidden_size is a multiple of 128 (lane width);
    # the PyTorch default of 200 would need padding of the projection width.
    assert H % 128 == 0, "hidden_size must be a multiple of 128"
    assert max_tile_b % 128 == 0

    tile_b = min(max_tile_b, _round_up(B, 128))
    b_pad = _round_up(B, tile_b)
    if b_pad != B:  # zero-pad the batch so the grid tiles evenly
        pad = ((0, b_pad - B), (0, 0))
        context = jnp.pad(context, pad)
        sentence = jnp.pad(sentence, pad)

    kernel = functools.partial(
        chunk_detector_kernel, H=H, inv_sqrt_h=1.0 / math.sqrt(float(H)))

    out = pl.pallas_call(
        kernel,
        out_shape=jax.ShapeDtypeStruct((1, b_pad), jnp.float32),
        grid_spec=pltpu.PrefetchScalarGridSpec(
            num_scalar_prefetch=0,
            grid=(b_pad // tile_b,),
            in_specs=[
                pl.BlockSpec((tile_b, D), lambda i: (i, 0)),   # context tile
                pl.BlockSpec((tile_b, D), lambda i: (i, 0)),   # sentence tile
                pl.BlockSpec((D, 3 * H), lambda i: (0, 0)),    # fused W (resident)
                pl.BlockSpec((1, 3 * H), lambda i: (0, 0)),    # fused b (resident)
            ],
            out_specs=pl.BlockSpec((1, tile_b), lambda i: (0, i)),
        ),
        compiler_params=pltpu.CompilerParams(
            dimension_semantics=("parallel",)),
    )(context, sentence, w_fused, b_fused)
    return out[0, :B]


def init_params(key, input_size, hidden_size):
    """Deterministic synthetic parameters (PyTorch Linear-style uniform init)."""
    keys = jax.random.split(key, 6)
    bound = 1.0 / jnp.sqrt(jnp.float32(input_size))

    def w(k):
        return jax.random.uniform(k, (input_size, hidden_size),
                                  jnp.float32, -bound, bound)

    def b(k):
        return jax.random.uniform(k, (1, hidden_size),
                                  jnp.float32, -bound, bound)

    return {
        "wp": w(keys[0]), "bp": b(keys[1]),
        "ws": w(keys[2]), "bs": b(keys[3]),
        "wv": w(keys[4]), "bv": b(keys[5]),
    }


def reference_forward(context, sentence, params):
    """Plain-JAX reference mirroring the PyTorch forward (for sanity check)."""
    lin = lambda x, w, b: x @ w + b
    pot = lambda x: jax.nn.sigmoid(lin(x, params["wp"], params["bp"]))
    sgn = lambda x: jnp.tanh(lin(x, params["ws"], params["bs"]))
    val = lambda x: jnp.maximum(lin(x, params["wv"], params["bv"]), 0.0)

    ck = pot(sentence) * sgn(context) + val(context)
    sk = pot(context) * sgn(sentence) + val(sentence)
    norm = lambda x: x / jnp.maximum(
        jnp.sqrt(jnp.sum(x * x, axis=1, keepdims=True)), 1e-12)
    ck, sk = norm(ck), norm(sk)
    sim = jnp.sum(ck * sk, axis=1) / jnp.sqrt(jnp.float32(params["wp"].shape[1]))
    return jax.nn.sigmoid(sim)


if __name__ == "__main__":
    B, D, H = 8, 32, 128  # batch, input_size, hidden_size

    key = jax.random.PRNGKey(0)
    k_ctx, k_sen, k_par = jax.random.split(key, 3)

    context = jax.random.normal(k_ctx, (B, D), jnp.float32)
    sentence = jax.random.normal(k_sen, (B, D), jnp.float32)
    params = init_params(k_par, D, H)

    # Fuse the projection weights once, outside the per-call hot path.
    w_fused, b_fused = fuse_params(params)
    w_fused, b_fused = jax.block_until_ready((w_fused, b_fused))

    sim = chunk_detector_forward(context, sentence, w_fused, b_fused)
    sim = jax.block_until_ready(sim)

    ref = reference_forward(context, sentence, params)
    assert sim.shape == (B,)
    assert jnp.allclose(sim, ref, atol=1e-5, rtol=1e-5), (sim, ref)

    print("KERNEL_OK")
</pallas_src>

<mosaic_0001>
module attributes {stable_mosaic.version = 11 : i64} {
  func.func @chunk_detector_kernel(%arg0: i32, %arg1: memref<128x32xf32, #tpu.memory_space<vmem>>, %arg2: memref<128x32xf32, #tpu.memory_space<vmem>>, %arg3: memref<32x384xf32, #tpu.memory_space<vmem>>, %arg4: memref<1x384xf32, #tpu.memory_space<vmem>>, %arg5: memref<1x128xf32, #tpu.memory_space<vmem>>) attributes {dimension_semantics = [#tpu.dimension_semantics<parallel>], iteration_bounds = array<i64: 1>, scalar_prefetch = 0 : i64, scratch_operands = 0 : i64, tpu.core_type = #tpu.core_type<tc>, window_params = [{transform_indices = @transform_0, window_bounds = array<i64: 128, 32>}, {transform_indices = @transform_1, window_bounds = array<i64: 128, 32>}, {pipeline_mode = #tpu.pipeline_mode<synchronous>, transform_indices = @transform_2, window_bounds = array<i64: 32, 384>}, {pipeline_mode = #tpu.pipeline_mode<synchronous>, transform_indices = @transform_3, window_bounds = array<i64: 1, 384>}, {transform_indices = @transform_4, window_bounds = array<i64: 1, 128>}]} {
    %c0 = arith.constant 0 : index
    %c0_0 = arith.constant 0 : index
    %0 = vector.load %arg3[%c0, %c0_0] : memref<32x384xf32, #tpu.memory_space<vmem>>, vector<32x384xf32>
    %c0_1 = arith.constant 0 : index
    %c0_2 = arith.constant 0 : index
    %1 = vector.load %arg4[%c0_1, %c0_2] : memref<1x384xf32, #tpu.memory_space<vmem>>, vector<1x384xf32>
    %c0_3 = arith.constant 0 : index
    %c0_4 = arith.constant 0 : index
    %2 = vector.load %arg1[%c0_3, %c0_4] : memref<128x32xf32, #tpu.memory_space<vmem>>, vector<128x32xf32>
    %c0_5 = arith.constant 0 : index
    %c0_6 = arith.constant 0 : index
    %3 = vector.load %arg2[%c0_5, %c0_6] : memref<128x32xf32, #tpu.memory_space<vmem>>, vector<128x32xf32>
    %cst = arith.constant dense<0.000000e+00> : vector<128x384xf32>
    %4 = tpu.matmul %2, %0, %cst {dimension_numbers = #tpu.dot_dimension_numbers<[1], [0], [0], [1], [0, 0, 1, 1], [], []>} : vector<128x32xf32>, vector<32x384xf32>, vector<128x384xf32> -> vector<128x384xf32>
    %5 = vector.broadcast %1 : vector<1x384xf32> to vector<128x384xf32>
    %6 = arith.addf %4, %5 : vector<128x384xf32>
    %cst_7 = arith.constant dense<0.000000e+00> : vector<128x384xf32>
    %7 = tpu.matmul %3, %0, %cst_7 {dimension_numbers = #tpu.dot_dimension_numbers<[1], [0], [0], [1], [0, 0, 1, 1], [], []>} : vector<128x32xf32>, vector<32x384xf32>, vector<128x384xf32> -> vector<128x384xf32>
    %8 = vector.broadcast %1 : vector<1x384xf32> to vector<128x384xf32>
    %9 = arith.addf %7, %8 : vector<128x384xf32>
    %10 = vector.extract_strided_slice %6 {offsets = [0, 0], sizes = [128, 128], strides = [1, 1]} : vector<128x384xf32> to vector<128x128xf32>
    %11 = arith.negf %10 : vector<128x128xf32>
    %12 = math.exp %11 : vector<128x128xf32>
    %cst_8 = arith.constant 1.000000e+00 : f32
    %13 = vector.broadcast %cst_8 : f32 to vector<128x128xf32>
    %14 = arith.addf %13, %12 : vector<128x128xf32>
    %15 = arith.divf %13, %14 : vector<128x128xf32>
    %16 = vector.extract_strided_slice %9 {offsets = [0, 0], sizes = [128, 128], strides = [1, 1]} : vector<128x384xf32> to vector<128x128xf32>
    %17 = arith.negf %16 : vector<128x128xf32>
    %18 = math.exp %17 : vector<128x128xf32>
    %cst_9 = arith.constant 1.000000e+00 : f32
    %19 = vector.broadcast %cst_9 : f32 to vector<128x128xf32>
    %20 = arith.addf %19, %18 : vector<128x128xf32>
    %21 = arith.divf %19, %20 : vector<128x128xf32>
    %22 = vector.extract_strided_slice %6 {offsets = [0, 128], sizes = [128, 128], strides = [1, 1]} : vector<128x384xf32> to vector<128x128xf32>
    %23 = math.tanh %22 : vector<128x128xf32>
    %24 = vector.extract_strided_slice %9 {offsets = [0, 128], sizes = [128, 128], strides = [1, 1]} : vector<128x384xf32> to vector<128x128xf32>
    %25 = math.tanh %24 : vector<128x128xf32>
    %26 = vector.extract_strided_slice %6 {offsets = [0, 256], sizes = [128, 128], strides = [1, 1]} : vector<128x384xf32> to vector<128x128xf32>
    %cst_10 = arith.constant 0.000000e+00 : f32
    %27 = vector.broadcast %cst_10 : f32 to vector<128x128xf32>
    %28 = arith.maximumf %26, %27 : vector<128x128xf32>
    %29 = vector.extract_strided_slice %9 {offsets = [0, 256], sizes = [128, 128], strides = [1, 1]} : vector<128x384xf32> to vector<128x128xf32>
    %cst_11 = arith.constant 0.000000e+00 : f32
    %30 = vector.broadcast %cst_11 : f32 to vector<128x128xf32>
    %31 = arith.maximumf %29, %30 : vector<128x128xf32>
    %32 = arith.mulf %21, %23 : vector<128x128xf32>
    %33 = arith.addf %32, %28 : vector<128x128xf32>
    %34 = arith.mulf %15, %25 : vector<128x128xf32>
    %35 = arith.addf %34, %31 : vector<128x128xf32>
    %36 = tpu.transpose %33, [1, 0] : vector<128x128xf32> -> vector<128x128xf32>
    %37 = tpu.transpose %35, [1, 0] : vector<128x128xf32> -> vector<128x128xf32>
    %38 = arith.mulf %36, %37 : vector<128x128xf32>
    %cst_12 = arith.constant dense<0.000000e+00> : vector<128xf32>
    %39 = vector.multi_reduction <add>, %38, %cst_12 [0] : vector<128x128xf32> to vector<128xf32>
    %40 = vector.shape_cast %39 : vector<128xf32> to vector<1x128xf32>
    %41 = arith.mulf %36, %36 : vector<128x128xf32>
    %cst_13 = arith.constant dense<0.000000e+00> : vector<128xf32>
    %42 = vector.multi_reduction <add>, %41, %cst_13 [0] : vector<128x128xf32> to vector<128xf32>
    %43 = vector.shape_cast %42 : vector<128xf32> to vector<1x128xf32>
    %44 = arith.mulf %37, %37 : vector<128x128xf32>
    %cst_14 = arith.constant dense<0.000000e+00> : vector<128xf32>
    %45 = vector.multi_reduction <add>, %44, %cst_14 [0] : vector<128x128xf32> to vector<128xf32>
    %46 = vector.shape_cast %45 : vector<128xf32> to vector<1x128xf32>
    %cst_15 = arith.constant 1.000000e-24 : f32
    %47 = vector.broadcast %cst_15 : f32 to vector<1x128xf32>
    %48 = arith.maximumf %43, %47 : vector<1x128xf32>
    %49 = math.rsqrt %48 : vector<1x128xf32>
    %50 = arith.mulf %40, %49 : vector<1x128xf32>
    %cst_16 = arith.constant 1.000000e-24 : f32
    %51 = vector.broadcast %cst_16 : f32 to vector<1x128xf32>
    %52 = arith.maximumf %46, %51 : vector<1x128xf32>
    %53 = math.rsqrt %52 : vector<1x128xf32>
    %54 = arith.mulf %50, %53 : vector<1x128xf32>
    %cst_17 = arith.constant 0.0883883461 : f32
    %55 = vector.broadcast %cst_17 : f32 to vector<1x128xf32>
    %56 = arith.mulf %54, %55 : vector<1x128xf32>
    %57 = arith.negf %56 : vector<1x128xf32>
    %58 = math.exp %57 : vector<1x128xf32>
    %cst_18 = arith.constant 1.000000e+00 : f32
    %59 = vector.broadcast %cst_18 : f32 to vector<1x128xf32>
    %60 = arith.addf %59, %58 : vector<1x128xf32>
    %61 = arith.divf %59, %60 : vector<1x128xf32>
    %c0_19 = arith.constant 0 : index
    %c0_20 = arith.constant 0 : index
    %62 = vector.load %arg5[%c0_19, %c0_20] : memref<1x128xf32, #tpu.memory_space<vmem>>, vector<1x128xf32>
    tpu.vector_store %arg5[%c0_19, %c0_20], %61 {strides = array<i32>} : memref<1x128xf32, #tpu.memory_space<vmem>>, vector<1x128xf32>,
    return
  }
  func.func @transform_0(%arg0: i32) -> (i32, i32) {
    %c0_i32 = arith.constant 0 : i32
    %c0_i32_0 = arith.constant 0 : i32
    return %arg0, %c0_i32 : i32, i32
  }
  func.func @transform_1(%arg0: i32) -> (i32, i32) {
    %c0_i32 = arith.constant 0 : i32
    %c0_i32_0 = arith.constant 0 : i32
    return %arg0, %c0_i32 : i32, i32
  }
  func.func @transform_2(%arg0: i32) -> (i32, i32) {
    %c0_i32 = arith.constant 0 : i32
    %c0_i32_0 = arith.constant 0 : i32
    %c0_i32_1 = arith.constant 0 : i32
    return %c0_i32, %c0_i32_0 : i32, i32
  }
  func.func @transform_3(%arg0: i32) -> (i32, i32) {
    %c0_i32 = arith.constant 0 : i32
    %c0_i32_0 = arith.constant 0 : i32
    %c0_i32_1 = arith.constant 0 : i32
    return %c0_i32, %c0_i32_0 : i32, i32
  }
  func.func @transform_4(%arg0: i32) -> (i32, i32) {
    %c0_i32 = arith.constant 0 : i32
    %c0_i32_0 = arith.constant 0 : i32
    return %c0_i32, %arg0 : i32, i32
  }
}

</mosaic_0001>

<bundles_post_ra>
// kernel: tpu_custom_call.1
= control target key start
LH: loop header
LB: loop body
LE: loop exit
PB: predicated region body
PF: predicated region fallthrough
CT: control target
= control target key end

     0   :  { %vm79_vm0 = vcmask 261120   ;;  %v1736_v14 = vmov 0.0   ;;  %s2361_s0 = inlined_call_operand.vmem [shape: f32[128,32], index: 0, kind: input, shape index: {}]   ;;  %s2362_s1 = inlined_call_operand.vmem [shape: f32[128,32], index: 1, kind: input, shape index: {}]   ;;  %s2363_s2 = inlined_call_operand.vmem [shape: f32[32,384], index: 2, kind: input, shape index: {}]   ;;  %s2364_s3 = inlined_call_operand.vmem [shape: f32[1,384], index: 3, kind: input, shape index: {}]   ;;  %s2365_s4 = inlined_call_operand.hbm [shape: f32[1,128], index: 4, kind: output, shape index: {}]  }
   0x1   :  { %v28_v0 = vld [vmem:[%s2363_s2 + $0x50] sm:$0xff]  ;;  %v29_v1 = vld [vmem:[%s2363_s2 + $0x58] sm:$0xff]  ;;  %v27_v2 = vld [vmem:[%s2363_s2 + $0x48] sm:$0xff]  ;;  %192 = vmatprep.mubr.f32.mxu0 %v1736_v14 }
   0x2   :  { %152 = vmatprep.subr.mxu0 %v28_v0  ;;  %1448 = vmatprep.subr.mxu1 %v29_v1  ;;  %v25_v3 = vld [vmem:[%s2363_s2 + $0x38] sm:$0xff]  ;;  %v26_v4 = vld [vmem:[%s2363_s2 + $0x40] sm:$0xff]  ;;  %v24_v5 = vld [vmem:[%s2363_s2 + $0x30] sm:$0xff] }
   0x3   :  { %153 = vmatpush1.msra.mxu0 %v27_v2  ;;  %1449 = vmatpush3.msra.mxu1 %v29_v1  ;;  %v22_v6 = vld [vmem:[%s2363_s2 + $0x20] sm:$0xff]  ;;  %v23_v7 = vld [vmem:[%s2363_s2 + $0x28] sm:$0xff]  ;;  %v21_v8 = vld [vmem:[%s2363_s2 + $0x18] sm:$0xff] }
   0x4   :  { %154 = vmatprep.subr.mxu0 %v25_v3  ;;  %1450 = vmatprep.subr.mxu1 %v26_v4  ;;  %v19_v9 = vld [vmem:[%s2363_s2 + $0x8] sm:$0xff]  ;;  %v20_v10 = vld [vmem:[%s2363_s2 + $0x10] sm:$0xff]  ;;  %v18_v11 = vld [vmem:[%s2363_s2] sm:$0xff] }
   0x5   :  { %155 = vmatpush1.msra.mxu0 %v24_v5  ;;  %1451 = vmatpush3.msra.mxu1 %v26_v4  ;;  %v31_v12 = vld [vmem:[%s2361_s0] sm:$0xff]  ;;  %v32_v13 = vld [vmem:[%s2361_s0 + $0x8] sm:$0xff]  ;;  %v33_v15 = vld [vmem:[%s2361_s0 + $0x10] sm:$0xff] }
   0x6   :  { %156 = vmatprep.subr.mxu0 %v22_v6  ;;  %1452 = vmatprep.subr.mxu1 %v23_v7  ;;  %v34_v16 = vld [vmem:[%s2361_s0 + $0x18] sm:$0xff]  ;;  %v35_v17 = vld [vmem:[%s2361_s0 + $0x20] sm:$0xff]  ;;  %v36_v18 = vld [vmem:[%s2361_s0 + $0x28] sm:$0xff] }
   0x7   :  { %157 = vmatpush1.msra.mxu0 %v21_v8  ;;  %1453 = vmatpush3.msra.mxu1 %v23_v7 }
   0x8   :  { %158 = vmatprep.subr.mxu0 %v19_v9  ;;  %1454 = vmatprep.subr.mxu1 %v20_v10 }
   0x9   :  { %159 = vmatpush1.msra.mxu0 %v18_v11  ;;  %1455 = vmatpush3.msra.mxu1 %v20_v10 }
   0xa   :  { %1456 = vmatprep.mubr.msk.f32.mxu1 %vm79_vm0, %v31_v12  ;;  %1311 = vmatmul.mubr.msk.f32.vlgmr.msra.gmra.mxu0 %vm79_vm0, %v31_v12 }
   0xb   :  { %1457 = vmatmul.mubr.msk.f32.vlgmr.msra.gmra.mxu1 %vm79_vm0, %v32_v13  ;;  %506 = vmatprep.subr.mxu1 %v28_v0 }
   0xc   :  { %1480 = vmatprep.subr.mxu0 %v29_v1  ;;  %507 = vmatpush1.msra.mxu1 %v27_v2 }
   0xd   :  { %1481 = vmatpush3.msra.mxu0 %v29_v1  ;;  %198 = vmatprep.mubr.f32.mxu0 %v1736_v14 }
   0xe   :  { %1459 = vmatprep.mubr.msk.f32.mxu1 %vm79_vm0, %v33_v15  ;;  %1312 = vmatmul.mubr.msk.f32.gmra.mxu0 %vm79_vm0, %v32_v13 }
   0xf   :  { %1460 = vmatmul.mubr.msk.f32.gmra.mxu1 %vm79_vm0, %v34_v16  ;;  %204 = vmatprep.mubr.f32.mxu0 %v1736_v14 }
  0x10   :  { %1462 = vmatprep.mubr.msk.f32.mxu1 %vm79_vm0, %v35_v17 }
  0x11   :  { %9 = vsyncpa [#allocation3], 0  ;;  %508 = vmatprep.subr.mxu1 %v25_v3  ;;  %v37_v19 = vld [vmem:[%s2361_s0 + $0x30] sm:$0xff]  ;;  %1482 = vmatprep.subr.mxu0 %v26_v4  ;;  %v38_v20 = vld [vmem:[%s2361_s0 + $0x38] sm:$0xff]  ;;  %v64_v45 = vlaneseq }
  0x12   :  { %509 = vmatpush1.msra.mxu1 %v24_v5  ;;  %1483 = vmatpush3.msra.mxu0 %v26_v4  ;;  %v39_v21 = vld [vmem:[%s2361_s0 + $0x40] sm:$0xff]  ;;  %v40_v22 = vld [vmem:[%s2361_s0 + $0x48] sm:$0xff]  ;;  %v41_v23 = vld [vmem:[%s2361_s0 + $0x50] sm:$0xff] }
  0x13   :  { %1313 = vmatmul.mubr.msk.f32.gmra.mxu0 %vm79_vm0, %v33_v15  ;;  %1463 = vmatmul.mubr.msk.f32.gmra.mxu1 %vm79_vm0, %v36_v18  ;;  %v42_v24 = vld [vmem:[%s2361_s0 + $0x58] sm:$0xff]  ;;  %v43_v25 = vld [vmem:[%s2361_s0 + $0x60] sm:$0xff]  ;;  %v44_v26 = vld [vmem:[%s2361_s0 + $0x68] sm:$0xff]  ;;  %v1991_v46 = vshrl.u32 %v64_v45, 7 }
  0x14   :  { %210 = vmatprep.mubr.f32.mxu0 %v1736_v14  ;;  %1465 = vmatprep.mubr.msk.f32.mxu1 %vm79_vm0, %v37_v19  ;;  %v45_v27 = vld [vmem:[%s2361_s0 + $0x70] sm:$0xff]  ;;  %v46_v28 = vld [vmem:[%s2361_s0 + $0x78] sm:$0xff]  ;;  %v47_v29 = vld [vmem:[%s2362_s1] sm:$0xff] }
  0x15   :  { %510 = vmatprep.subr.mxu1 %v22_v6  ;;  %1484 = vmatprep.subr.mxu0 %v23_v7  ;;  %v48_v30 = vld [vmem:[%s2362_s1 + $0x8] sm:$0xff]  ;;  %v49_v31 = vld [vmem:[%s2362_s1 + $0x10] sm:$0xff]  ;;  %v50_v32 = vld [vmem:[%s2362_s1 + $0x18] sm:$0xff]  ;;  %v66_v47 = vsub.s32 0, %v1991_v46 }
  0x16   :  { %511 = vmatpush1.msra.mxu1 %v21_v8  ;;  %1485 = vmatpush3.msra.mxu0 %v23_v7  ;;  %v51_v33 = vld [vmem:[%s2362_s1 + $0x20] sm:$0xff]  ;;  %v52_v34 = vld [vmem:[%s2362_s1 + $0x28] sm:$0xff]  ;;  %v53_v35 = vld [vmem:[%s2362_s1 + $0x30] sm:$0xff] }
  0x17   :  { %1314 = vmatmul.mubr.msk.f32.gmra.mxu0 %vm79_vm0, %v34_v16  ;;  %1466 = vmatmul.mubr.msk.f32.gmra.mxu1 %vm79_vm0, %v38_v20  ;;  %v54_v36 = vld [vmem:[%s2362_s1 + $0x38] sm:$0xff]  ;;  %v55_v37 = vld [vmem:[%s2362_s1 + $0x40] sm:$0xff]  ;;  %v56_v38 = vld [vmem:[%s2362_s1 + $0x48] sm:$0xff] }
  0x18   :  { %216 = vmatprep.mubr.f32.mxu0 %v1736_v14  ;;  %1468 = vmatprep.mubr.msk.f32.mxu1 %vm79_vm0, %v39_v21  ;;  %v57_v39 = vld [vmem:[%s2362_s1 + $0x50] sm:$0xff]  ;;  %v58_v40 = vld [vmem:[%s2362_s1 + $0x58] sm:$0xff]  ;;  %v59_v41 = vld [vmem:[%s2362_s1 + $0x60] sm:$0xff] }
  0x19   :  { %512 = vmatprep.subr.mxu1 %v19_v9  ;;  %1486 = vmatprep.subr.mxu0 %v20_v10  ;;  %v60_v42 = vld [vmem:[%s2362_s1 + $0x68] sm:$0xff]  ;;  %v61_v43 = vld [vmem:[%s2362_s1 + $0x70] sm:$0xff]  ;;  %v62_v44 = vld [vmem:[%s2362_s1 + $0x78] sm:$0xff]  ;;  %s1737_s1 = smov [#allocation2]  }
  0x1a   :  { %513 = vmatpush1.msra.mxu1 %v18_v11  ;;  %1487 = vmatpush3.msra.mxu0 %v20_v10  ;;  %v1997_v48 = vld [vmem:[%s2364_s3] sm:$0x7]  ;;  %v70_v11 = vsub.s32 1, %v1991_v46  ;;  %s1303_s3 = sshll.u32 %s1737_s1, 4  ;;  %s1304_s3 = int_to_ptr.vmem [resolvable:$true] %s1303_s3 }
  0x1b   :  { %1315 = vmatmul.mubr.msk.f32.gmra.mxu0 %vm79_vm0, %v35_v17  ;;  %1469 = vmatmul.mubr.msk.f32.gmra.mxu1 %vm79_vm0, %v40_v22  ;;  %v2002_v51 = vrot.slane %v1997_v48, %v66_v47  ;;  %s1714_s22 = scalar_lea.vmem %s1304_s3, 16  ;;  %s1718_s23 = scalar_lea.vmem %s1304_s3, 32 }
  0x1c   :  { %222 = vmatprep.mubr.f32.mxu0 %v1736_v14  ;;  %1471 = vmatprep.mubr.msk.f32.mxu1 %vm79_vm0, %v41_v23  ;;  %p1715_p0 = scmp.ne.s32.totalorder %s1304_s3, %s1714_s22  ;;  %p1719_p1 = scmp.lt.s32.totalorder %s1304_s3, %s1304_s3 }
  0x1d   :  { %p1720_p2 = scmp.lt.s32.totalorder %s1718_s23, %s1714_s22 }
  0x1f   :  { %1316 = vmatmul.mubr.msk.f32.gmra.mxu0 %vm79_vm0, %v36_v18  ;;  %1472 = vmatmul.mubr.msk.f32.gmra.mxu1 %vm79_vm0, %v42_v24  ;;  %v2031_v18 = vrot.slane %v1997_v48, %v70_v11  ;;  %p1721_p3 = por %p1720_p2, %p1719_p1 }
  0x20   :  { %228 = vmatprep.mubr.f32.mxu0 %v1736_v14  ;;  %1474 = vmatprep.mubr.msk.f32.mxu1 %vm79_vm0, %v43_v25 }
  0x21   :  { %p1722_p4 = pnand %p1721_p3, %p1715_p0 }
  0x23   :  { %1317 = vmatmul.mubr.msk.f32.gmra.mxu0 %vm79_vm0, %v37_v19  ;;  %1475 = vmatmul.mubr.msk.f32.gmra.mxu1 %vm79_vm0, %v44_v26 }
  0x24   :  { %234 = vmatprep.mubr.f32.mxu0 %v1736_v14  ;;  %1477 = vmatprep.mubr.msk.f32.mxu1 %vm79_vm0, %v45_v27 }
  0x27   :  { %1318 = vmatmul.mubr.msk.f32.gmra.mxu0 %vm79_vm0, %v38_v20  ;;  %1478 = vmatmul.mubr.msk.f32.gmra.mxu1 %vm79_vm0, %v46_v28 }
  0x28   :  { %240 = vmatprep.mubr.f32.mxu0 %v1736_v14  ;;  %546 = vmatprep.mubr.f32.mxu1 %v1736_v14 }
  0x2b   :  { %1319 = vmatmul.mubr.msk.f32.gmra.mxu0 %vm79_vm0, %v39_v21  ;;  %1343 = vmatmul.mubr.msk.f32.vlgmr.msra.gmra.mxu1 %vm79_vm0, %v47_v29 }
  0x2c   :  { %246 = vmatprep.mubr.f32.mxu0 %v1736_v14  ;;  %552 = vmatprep.mubr.f32.mxu1 %v1736_v14 }
  0x2f   :  { %1320 = vmatmul.mubr.msk.f32.gmra.mxu0 %vm79_vm0, %v40_v22  ;;  %1344 = vmatmul.mubr.msk.f32.gmra.mxu1 %vm79_vm0, %v48_v30 }
  0x30   :  { %252 = vmatprep.mubr.f32.mxu0 %v1736_v14  ;;  %558 = vmatprep.mubr.f32.mxu1 %v1736_v14 }
  0x33   :  { %1321 = vmatmul.mubr.msk.f32.gmra.mxu0 %vm79_vm0, %v41_v23  ;;  %1345 = vmatmul.mubr.msk.f32.gmra.mxu1 %vm79_vm0, %v49_v31 }
  0x34   :  { %258 = vmatprep.mubr.f32.mxu0 %v1736_v14  ;;  %564 = vmatprep.mubr.f32.mxu1 %v1736_v14 }
  0x37   :  { %1322 = vmatmul.mubr.msk.f32.gmra.mxu0 %vm79_vm0, %v42_v24  ;;  %1346 = vmatmul.mubr.msk.f32.gmra.mxu1 %vm79_vm0, %v50_v32 }
  0x38   :  { %264 = vmatprep.mubr.f32.mxu0 %v1736_v14  ;;  %570 = vmatprep.mubr.f32.mxu1 %v1736_v14 }
  0x3b   :  { %1323 = vmatmul.mubr.msk.f32.gmra.mxu0 %vm79_vm0, %v43_v25  ;;  %1347 = vmatmul.mubr.msk.f32.gmra.mxu1 %vm79_vm0, %v51_v33 }
  0x3c   :  { %270 = vmatprep.mubr.f32.mxu0 %v1736_v14  ;;  %576 = vmatprep.mubr.f32.mxu1 %v1736_v14 }
  0x3f   :  { %1324 = vmatmul.mubr.msk.f32.gmra.mxu0 %vm79_vm0, %v44_v26  ;;  %1348 = vmatmul.mubr.msk.f32.gmra.mxu1 %vm79_vm0, %v52_v34 }
  0x40   :  { %276 = vmatprep.mubr.f32.mxu0 %v1736_v14  ;;  %582 = vmatprep.mubr.f32.mxu1 %v1736_v14 }
  0x43   :  { %1325 = vmatmul.mubr.msk.f32.gmra.mxu0 %vm79_vm0, %v45_v27  ;;  %1349 = vmatmul.mubr.msk.f32.gmra.mxu1 %vm79_vm0, %v53_v35 }
  0x44   :  { %282 = vmatprep.mubr.f32.mxu0 %v1736_v14  ;;  %588 = vmatprep.mubr.f32.mxu1 %v1736_v14 }
  0x47   :  { %1326 = vmatmul.mubr.msk.f32.gmra.mxu0 %vm79_vm0, %v46_v28  ;;  %1350 = vmatmul.mubr.msk.f32.gmra.mxu1 %vm79_vm0, %v54_v36 }
  0x48   :  { %594 = vmatprep.mubr.f32.mxu1 %v1736_v14  ;;  %1488 = vmatprep.mubr.msk.f32.mxu0 %vm79_vm0, %v47_v29 }
  0x4b   :  { %1351 = vmatmul.mubr.msk.f32.gmra.mxu1 %vm79_vm0, %v55_v37  ;;  %1489 = vmatmul.mubr.msk.f32.vlgmr.msra.gmra.mxu0 %vm79_vm0, %v48_v30 }
  0x4c   :  { %600 = vmatprep.mubr.f32.mxu1 %v1736_v14  ;;  %1491 = vmatprep.mubr.msk.f32.mxu0 %vm79_vm0, %v49_v31 }
  0x4f   :  { %1352 = vmatmul.mubr.msk.f32.gmra.mxu1 %vm79_vm0, %v56_v38  ;;  %1492 = vmatmul.mubr.msk.f32.gmra.mxu0 %vm79_vm0, %v50_v32 }
  0x50   :  { %606 = vmatprep.mubr.f32.mxu1 %v1736_v14  ;;  %1494 = vmatprep.mubr.msk.f32.mxu0 %vm79_vm0, %v51_v33 }
  0x53   :  { %1353 = vmatmul.mubr.msk.f32.gmra.mxu1 %vm79_vm0, %v57_v39  ;;  %1495 = vmatmul.mubr.msk.f32.gmra.mxu0 %vm79_vm0, %v52_v34 }
  0x54   :  { %612 = vmatprep.mubr.f32.mxu1 %v1736_v14  ;;  %1497 = vmatprep.mubr.msk.f32.mxu0 %vm79_vm0, %v53_v35 }
  0x57   :  { %1354 = vmatmul.mubr.msk.f32.gmra.mxu1 %vm79_vm0, %v58_v40  ;;  %1498 = vmatmul.mubr.msk.f32.gmra.mxu0 %vm79_vm0, %v54_v36 }
  0x58   :  { %618 = vmatprep.mubr.f32.mxu1 %v1736_v14  ;;  %1500 = vmatprep.mubr.msk.f32.mxu0 %vm79_vm0, %v55_v37 }
  0x5b   :  { %1355 = vmatmul.mubr.msk.f32.gmra.mxu1 %vm79_vm0, %v59_v41  ;;  %1501 = vmatmul.mubr.msk.f32.gmra.mxu0 %vm79_vm0, %v56_v38 }
  0x5c   :  { %624 = vmatprep.mubr.f32.mxu1 %v1736_v14  ;;  %1503 = vmatprep.mubr.msk.f32.mxu0 %vm79_vm0, %v57_v39 }
  0x5f   :  { %1356 = vmatmul.mubr.msk.f32.gmra.mxu1 %vm79_vm0, %v60_v42  ;;  %1504 = vmatmul.mubr.msk.f32.gmra.mxu0 %vm79_vm0, %v58_v40 }
  0x60   :  { %630 = vmatprep.mubr.f32.mxu1 %v1736_v14  ;;  %1506 = vmatprep.mubr.msk.f32.mxu0 %vm79_vm0, %v59_v41 }
  0x63   :  { %1357 = vmatmul.mubr.msk.f32.gmra.mxu1 %vm79_vm0, %v61_v43  ;;  %1507 = vmatmul.mubr.msk.f32.gmra.mxu0 %vm79_vm0, %v60_v42 }
  0x64   :  { %636 = vmatprep.mubr.f32.mxu1 %v1736_v14  ;;  %1509 = vmatprep.mubr.msk.f32.mxu0 %vm79_vm0, %v61_v43 }
  0x67   :  { %1358 = vmatmul.mubr.msk.f32.gmra.mxu1 %vm79_vm0, %v62_v44  ;;  %1510 = vmatmul.mubr.msk.f32.gmra.mxu0 %vm79_vm0, %v62_v44 }
  0xca   :  { %v194_v49 = vpop.f32.mrf.mxu0 }
  0xcb   :  { %v1999_v50 = vpop.f32.mrf.mxu1  ;;  %v195_v56 = vadd.f32 %v194_v49, %v2002_v51 }
  0xcc   :  { %v196_v52 = vpop.f32.mrf.mxu0 }
  0xcd   :  { %v2004_v53 = vpop.f32.mrf.mxu1  ;;  %v1375_v62 = vmul.f32 -1.442695, %v195_v56  ;;  %v197_v25 = vadd.f32 %v196_v52, %v2031_v18 }
  0xce   :  { %v200_v54 = vpop.f32.mrf.mxu0 }
  0xcf   :  { %v2006_v55 = vpop.f32.mrf.mxu1  ;;  %v201_v59 = vadd.f32 %v200_v54, %v2002_v51  ;;  %1514 = vpow2.f32 %v1375_v62 }
  0xd0   :  { %v202_v57 = vpop.f32.mrf.mxu0 }
  0xd1   :  { %v2009_v58 = vpop.f32.mrf.mxu1  ;;  %v1376_v1 = vmul.f32 -1.442695, %v201_v59  ;;  %v203_v26 = vadd.f32 %v202_v57, %v2031_v18 }
  0xd3   :  { %v206_v60 = vpop.f32.mrf.mxu0  ;;  %v2012_v61 = vpop.f32.mrf.mxu1  ;;  %1516 = vpow2.f32 %v1376_v1 }
  0xd4   :  { %v207_v2 = vadd.f32 %v206_v60, %v2002_v51 }
  0xd5   :  { %v208_v63 = vpop.f32.mrf.mxu0  ;;  %v2014_v0 = vpop.f32.mrf.mxu1 }
  0xd6   :  { %v1377_v8 = vmul.f32 -1.442695, %v207_v2  ;;  %v209_v30 = vadd.f32 %v208_v63, %v2031_v18 }
  0xd7   :  { %v212_v3 = vpop.f32.mrf.mxu0  ;;  %v2017_v4 = vpop.f32.mrf.mxu1 }
  0xd8   :  { %v213_v5 = vadd.f32 %v212_v3, %v2002_v51  ;;  %1518 = vpow2.f32 %v1377_v8 }
  0xd9   :  { %v214_v6 = vpop.f32.mrf.mxu0  ;;  %v2020_v7 = vpop.f32.mrf.mxu1 }
  0xda   :  { %v1378_v12 = vmul.f32 -1.442695, %v213_v5  ;;  %v215_v35 = vadd.f32 %v214_v6, %v2031_v18 }
  0xdb   :  { %v218_v9 = vpop.f32.mrf.mxu0  ;;  %v2022_v10 = vpop.f32.mrf.mxu1 }
  0xdc   :  { %v219_v15 = vadd.f32 %v218_v9, %v2002_v51  ;;  %1520 = vpow2.f32 %v1378_v12  ;;  %v1515_v29 = vpop.eup %1514 }
  0xdd   :  { %v220_v13 = vpop.f32.mrf.mxu0  ;;  %v2025_v14 = vpop.f32.mrf.mxu1  ;;  %v836_v37 = vadd.f32 1.0, %v1515_v29 }
  0xde   :  { %v1379_v21 = vmul.f32 -1.442695, %v219_v15  ;;  %v221_v40 = vadd.f32 %v220_v13, %v2031_v18 }
  0xdf   :  { %v224_v16 = vpop.f32.mrf.mxu0  ;;  %v2028_v17 = vpop.f32.mrf.mxu1 }
  0xe0   :  { %2366 = vst [vmem:[#allocation5_spill] sm:$0xff] %v2028_v17  ;;  %v225_v22 = vadd.f32 %v224_v16, %v2002_v51  ;;  %1522 = vpow2.f32 %v1379_v21  ;;  %v1517_v34 = vpop.eup %1516 }
  0xe1   :  { %v226_v19 = vpop.f32.mrf.mxu0  ;;  %v2033_v20 = vpop.f32.mrf.mxu1  ;;  %1524 = vtanh.f32 %v197_v25  ;;  %v837_v41 = vadd.f32 1.0, %v1517_v34 }
  0xe2   :  { %v1380_v31 = vmul.f32 -1.442695, %v225_v22  ;;  %1526 = vtanh.f32 %v203_v26  ;;  %v227_v49 = vadd.f32 %v226_v19, %v2031_v18 }
  0xe3   :  { %v230_v23 = vpop.f32.mrf.mxu0  ;;  %v2036_v24 = vpop.f32.mrf.mxu1  ;;  %1528 = vtanh.f32 %v209_v30 }
  0xe4   :  { %2367 = vst [vmem:[#allocation6_spill] sm:$0xff] %v2036_v24  ;;  %v231_v36 = vadd.f32 %v230_v23, %v2002_v51  ;;  %1530 = vpow2.f32 %v1380_v31 }
  0xe5   :  { %v232_v27 = vpop.f32.mrf.mxu0  ;;  %v2040_v28 = vpop.f32.mrf.mxu1  ;;  %1532 = vtanh.f32 %v215_v35 }
  0xe6   :  { %2368 = vst [vmem:[#allocation7_spill] sm:$0xff] %v2040_v28  ;;  %v1519_v44 = vpop.eup %1518  ;;  %v1381_v45 = vmul.f32 -1.442695, %v231_v36  ;;  %1534 = vrcp.f32 %v836_v37  ;;  %v233_v1 = vadd.f32 %v232_v27, %v2031_v18 }
  0xe7   :  { %v236_v32 = vpop.f32.mrf.mxu0  ;;  %v2043_v33 = vpop.f32.mrf.mxu1  ;;  %1536 = vtanh.f32 %v221_v40  ;;  %v838_v60 = vadd.f32 1.0, %v1519_v44 }
  0xe8   :  { %2369 = vst [vmem:[#allocation8_spill] sm:$0xff] %v2043_v33  ;;  %v237_v57 = vadd.f32 %v236_v32, %v2002_v51  ;;  %1538 = vrcp.f32 %v837_v41 }
  0xe9   :  { %v238_v38 = vpop.f32.mrf.mxu0  ;;  %v2047_v39 = vpop.f32.mrf.mxu1  ;;  %1540 = vpow2.f32 %v1381_v45 }
  0xea   :  { %2370 = vst [vmem:[#allocation9_spill] sm:$0xff] %v2047_v39  ;;  %v1521_v56 = vpop.eup %1520  ;;  %1542 = vtanh.f32 %v227_v49  ;;  %v1382_v9 = vmul.f32 -1.442695, %v237_v57  ;;  %v239_v16 = vadd.f32 %v238_v38, %v2031_v18 }
  0xeb   :  { %v242_v42 = vpop.f32.mrf.mxu0  ;;  %v548_v43 = vpop.f32.mrf.mxu1  ;;  %v839_v3 = vadd.f32 1.0, %v1521_v56 }
  0xec   :  { %v549_v47 = vadd.f32 %v548_v43, %v2002_v51  ;;  %v243_v5 = vadd.f32 %v242_v42, %v2002_v51 }
  0xed   :  { %v244_v52 = vpop.f32.mrf.mxu0  ;;  %v550_v54 = vpop.f32.mrf.mxu1 }
  0xee   :  { %v1391_v59 = vmul.f32 -1.442695, %v549_v47  ;;  %v1523_v11 = vpop.eup %1522  ;;  %v1383_v22 = vmul.f32 -1.442695, %v243_v5  ;;  %v245_v31 = vadd.f32 %v244_v52, %v2031_v18  ;;  %v551_v38 = vadd.f32 %v550_v54, %v2031_v18 }
  0xef   :  { %v248_v62 = vpop.f32.mrf.mxu0  ;;  %v554_v63 = vpop.f32.mrf.mxu1  ;;  %v840_v27 = vadd.f32 1.0, %v1523_v11 }
  0xf0   :  { %v555_v2 = vadd.f32 %v554_v63, %v2002_v51  ;;  %1544 = vpow2.f32 %v1391_v59  ;;  %v2060_v21 = vpop.eup %1524  ;;  %v249_v29 = vadd.f32 %v248_v62, %v2002_v51 }
  0xf1   :  { %v250_v6 = vpop.f32.mrf.mxu0  ;;  %v2056_v8 = vpop.f32.mrf.mxu1  ;;  %1546 = vrcp.f32 %v838_v60 }
  0xf2   :  { %v1392_v12 = vmul.f32 -1.442695, %v555_v2  ;;  %1548 = vtanh.f32 %v233_v1  ;;  %v2064_v26 = vpop.eup %1526  ;;  %v1384_v44 = vmul.f32 -1.442695, %v249_v29  ;;  %v251_v57 = vadd.f32 %v250_v6, %v2031_v18 }
  0xf3   :  { %v254_v13 = vpop.f32.mrf.mxu0  ;;  %v560_v15 = vpop.f32.mrf.mxu1  ;;  %1550 = vrcp.f32 %v839_v3  ;;  %v74_v3 = vsub.s32 2, %v1991_v46 }
  0xf4   :  { %v561_v19 = vadd.f32 %v560_v15, %v2002_v51  ;;  %1552 = vpow2.f32 %v1382_v9  ;;  %v2067_v30 = vpop.eup %1528  ;;  %v255_v40 = vadd.f32 %v254_v13, %v2002_v51 }
  0xf5   :  { %v2062_v23 = vpop.f32.mrf.mxu0  ;;  %v562_v25 = vpop.f32.mrf.mxu1  ;;  %1554 = vpow2.f32 %v1392_v12 }
  0xf6   :  { %v1531_v35 = vpop.eup %1530  ;;  %1556 = vtanh.f32 %v239_v16  ;;  %v1393_v36 = vmul.f32 -1.442695, %v561_v19  ;;  %v1385_v60 = vmul.f32 -1.442695, %v255_v40  ;;  %v557_v19 = vadd.f32 %v2056_v8, %v2031_v18 }
  0xf7   :  { %v260_v32 = vpop.f32.mrf.mxu0  ;;  %v566_v34 = vpop.f32.mrf.mxu1  ;;  %1558 = vpow2.f32 %v1383_v22  ;;  %v841_v47 = vadd.f32 1.0, %v1531_v35  ;;  %v2115_v8 = vrot.slane %v1997_v48, %v74_v3  ;;  %v257_v48 = vadd.f32 %v2062_v23, %v2031_v18 }
  0xf8   :  { %v2070_v37 = vpop.eup %1532  ;;  %1560 = vrcp.f32 %v840_v27  ;;  %v567_v49 = vadd.f32 %v566_v34, %v2002_v51  ;;  %v261_v15 = vadd.f32 %v260_v32, %v2002_v51 }
  0xf9   :  { %v2074_v41 = vpop.f32.mrf.mxu0  ;;  %v2076_v42 = vpop.f32.mrf.mxu1  ;;  %1562 = vtanh.f32 %v245_v31  ;;  %v563_v31 = vadd.f32 %v562_v25, %v2031_v18 }
  0xfa   :  { %v2078_v43 = vpop.eup %1534  ;;  %1564 = vpow2.f32 %v1393_v36  ;;  %v1394_v5 = vmul.f32 -1.442695, %v567_v49 }
  0xfb   :  { %v2080_v45 = vpop.eup %1536  ;;  %v2083_v52 = vpop.f32.mrf.mxu0  ;;  %1566 = vtanh.f32 %v551_v38  ;;  %v1386_v38 = vmul.f32 -1.442695, %v261_v15  ;;  %v356_v15 = vadd.f32 %v2004_v53, %v2115_v8 }
  0xfc   :  { %v572_v56 = vpop.f32.mrf.mxu1  ;;  %v2085_v54 = vpop.eup %1538  ;;  %1568 = vpow2.f32 %v1384_v44 }
  0xfd   :  { %v1541_v59 = vpop.eup %1540  ;;  %v2088_v62 = vpop.f32.mrf.mxu0  ;;  %1570 = vrcp.f32 %v841_v47  ;;  %v573_v46 = vadd.f32 %v572_v56, %v2002_v51 }
  0xfe   :  { %v2090_v63 = vpop.f32.mrf.mxu1  ;;  %v2092_v1 = vpop.eup %1542  ;;  %v842_v12 = vadd.f32 1.0, %v1541_v59  ;;  %1572 = vtanh.f32 %v251_v57 }
  0xff   :  { %v1545_v2 = vpop.eup %1544  ;;  %v2095_v9 = vpop.f32.mrf.mxu0  ;;  %1574 = vpow2.f32 %v1385_v60  ;;  %v1395_v47 = vmul.f32 -1.442695, %v573_v46 }
 0x100   :  { %v578_v11 = vpop.f32.mrf.mxu1  ;;  %v2097_v6 = vpop.eup %1546  ;;  %v932_v13 = vadd.f32 1.0, %v1545_v2 }
 0x101   :  { %v2100_v16 = vpop.eup %1548  ;;  %v2105_v22 = vpop.f32.mrf.mxu0  ;;  %v579_v60 = vadd.f32 %v578_v11, %v2002_v51 }
 0x102   :  { %v2107_v27 = vpop.f32.mrf.mxu1  ;;  %v2109_v29 = vpop.eup %1550  ;;  %1576 = vrcp.f32 %v932_v13 }
 0x103   :  { %v1553_v34 = vpop.eup %1552  ;;  %1578 = vpow2.f32 %v1394_v5  ;;  %v2112_v32 = vpop.f32.mrf.mxu0 }
 0x104   :  { %v584_v35 = vpop.f32.mrf.mxu1  ;;  %v1555_v36 = vpop.eup %1554  ;;  %1580 = vrcp.f32 %v842_v12  ;;  %v843_v57 = vadd.f32 1.0, %v1553_v34  ;;  %v2134_v12 = vadd.f32 %v1999_v50, %v2115_v8  ;;  %v267_v50 = vadd.f32 %v2083_v52, %v2002_v51 }
 0x105   :  { %v2117_v40 = vpop.eup %1556  ;;  %v933_v44 = vadd.f32 1.0, %v1555_v36  ;;  %1582 = vtanh.f32 %v557_v19  ;;  %v2119_v49 = vpop.f32.mrf.mxu0  ;;  %v569_v19 = vadd.f32 %v2076_v42, %v2031_v18  ;;  %v585_v52 = vadd.f32 %v584_v35, %v2002_v51 }
 0x106   :  { %2371 = vst [vmem:[#allocation10_spill] sm:$0xff] %v2119_v49  ;;  %v2121_v56 = vpop.f32.mrf.mxu1  ;;  %v1559_v25 = vpop.eup %1558  ;;  %1584 = vtanh.f32 %v563_v31  ;;  %v2162_v42 = vadd.f32 %v2009_v58, %v2115_v8  ;;  %v581_v58 = vadd.f32 %v2107_v27, %v2031_v18 }
 0x107   :  { %v2123_v59 = vpop.eup %1560  ;;  %1586 = vrcp.f32 %v933_v44  ;;  %v2128_v2 = vpop.f32.mrf.mxu0  ;;  %v844_v31 = vadd.f32 1.0, %v1559_v25  ;;  %v1012_v25 = vmax.f32 %v356_v15, 0.0  ;;  %v1387_v15 = vmul.f32 -1.442695, %v267_v50 }
 0x108   :  { %v590_v3 = vpop.f32.mrf.mxu1  ;;  %v2130_v5 = vpop.eup %1562  ;;  %1588 = vpow2.f32 %v1386_v38  ;;  %v1396_v38 = vmul.f32 -1.442695, %v579_v60 }
 0x109   :  { %2372 = vst [vmem:[#allocation11_spill] sm:$0xff] %v2130_v5  ;;  %v1565_v13 = vpop.eup %1564  ;;  %1590 = vpow2.f32 %v1395_v47  ;;  %v2140_v23 = vpop.f32.mrf.mxu0  ;;  %v263_v47 = vadd.f32 %v2074_v41, %v2031_v18 }
 0x10a   :  { %2373 = vst [vmem:[#allocation12_spill] sm:$0xff] %v2140_v23  ;;  %v2142_v11 = vpop.f32.mrf.mxu1  ;;  %v1567_v46 = vpop.eup %1566  ;;  %1592 = vrcp.f32 %v843_v57  ;;  %v934_v34 = vadd.f32 1.0, %v1565_v13 }
 0x10b   :  { %v1569_v36 = vpop.eup %1568  ;;  %1594 = vtanh.f32 %v257_v48  ;;  %v1490_v53 = vpop.f32.mrf.mxu0  ;;  %v575_v48 = vadd.f32 %v2090_v63, %v2031_v18 }
 0x10c   :  { %v2146_v44 = vpop.f32.mrf.mxu1  ;;  %v2148_v33 = vpop.eup %1570  ;;  %1596 = vrcp.f32 %v934_v34  ;;  %v845_v34 = vadd.f32 1.0, %v1569_v36  ;;  %v715_v41 = vadd.f32 %v1490_v53, %v2115_v8  ;;  %v1076_v36 = vmul.f32 %v1567_v46, %v2078_v43 }
 0x10d   :  { %v2153_v57 = vpop.eup %1572  ;;  %1598 = vtanh.f32 %v569_v19  ;;  %v709_v13 = vpop.f32.mrf.mxu0  ;;  %v273_v19 = vadd.f32 %v2095_v9, %v2002_v51  ;;  %v1397_v9 = vmul.f32 -1.442695, %v585_v52  ;;  %v2184_v52 = vadd.f32 %v2006_v55, %v2115_v8 }
 0x10e   :  { %2374 = vst [vmem:[#allocation13_spill] sm:$0xff] %v2153_v57  ;;  %v2158_v60 = vpop.f32.mrf.mxu1  ;;  %v1575_v39 = vpop.eup %1574  ;;  %1600 = vrcp.f32 %v844_v31  ;;  %v710_v63 = vadd.f32 %v709_v13, %v2115_v8  ;;  %v1029_v5 = vmax.f32 %v715_v41, 0.0  ;;  %v279_v41 = vadd.f32 %v2112_v32, %v2002_v51 }
 0x10f   :  { %v1577_v24 = vpop.eup %1576  ;;  %1602 = vpow2.f32 %v1396_v38  ;;  %v1493_v28 = vpop.f32.mrf.mxu0  ;;  %v846_v49 = vadd.f32 1.0, %v1575_v39  ;;  %v587_v39 = vadd.f32 %v2121_v56, %v2031_v18 }
 0x110   :  { %v2168_v35 = vpop.f32.mrf.mxu1  ;;  %v1579_v23 = vpop.eup %1578  ;;  %1604 = vtanh.f32 %v263_v47  ;;  %v1044_v31 = vmul.f32 %v1577_v24, %v2060_v21  ;;  %v1028_v38 = vmax.f32 %v710_v63, 0.0  ;;  %v591_v47 = vadd.f32 %v590_v3, %v2002_v51 }
 0x111   :  { %v2174_v53 = vpop.eup %1580  ;;  %v935_v50 = vadd.f32 1.0, %v1579_v23  ;;  %1606 = vtanh.f32 %v575_v48  ;;  %v719_v13 = vpop.f32.mrf.mxu0 }
 0x112   :  { %v2176_v17 = vpop.f32.mrf.mxu1  ;;  %v1583_v57 = vpop.eup %1582  ;;  %1608 = vrcp.f32 %v845_v34  ;;  %v720_v24 = vadd.f32 %v719_v13, %v2115_v8  ;;  %v1060_v21 = vadd.f32 %v1044_v31, %v1012_v25  ;;  %v1092_v23 = vadd.f32 %v1076_v36, %v1028_v38 }
 0x113   :  { %v1585_v27 = vpop.eup %1584  ;;  %1610 = vrcp.f32 %v935_v50  ;;  %v2180_v46 = vpop.f32.mrf.mxu0  ;;  %v1014_v34 = vmax.f32 %v2162_v42, 0.0  ;;  %v1077_v55 = vmul.f32 %v1583_v57, %v2085_v54  ;;  %v1388_v42 = vmul.f32 -1.442695, %v273_v19 }
 0x114   :  { %v608_v43 = vpop.f32.mrf.mxu1  ;;  %v1587_v48 = vpop.eup %1586  ;;  %1612 = vtanh.f32 %v581_v58  ;;  %1108 = vxpose.xlu0.b32.start [1/16] %v1060_v21, 128  ;;  %1140 = vxpose.xlu1.b32.start [1/16] %v1092_v23, 128  ;;  %v1398_v58 = vmul.f32 -1.442695, %v591_v47  ;;  %v725_v36 = vadd.f32 %v1493_v28, %v2115_v8  ;;  %v1030_v32 = vmax.f32 %v720_v24, 0.0 }
 0x115   :  { %v1589_v3 = vpop.eup %1588  ;;  %1614 = vpow2.f32 %v1397_v9  ;;  %v1045_v63 = vmul.f32 %v1587_v48, %v2064_v26  ;;  %v729_v9 = vpop.f32.mrf.mxu0  ;;  %v1093_v13 = vadd.f32 %v1077_v55, %v1029_v5  ;;  %v597_v26 = vadd.f32 %v2146_v44, %v2002_v51 }
 0x116   :  { %v2191_v25 = vpop.f32.mrf.mxu1  ;;  %v1591_v31 = vpop.eup %1590  ;;  %1616 = vpow2.f32 %v1387_v15  ;;  %v847_v23 = vadd.f32 1.0, %v1589_v3  ;;  %v2375_v54 = vmax.f32 %v2134_v12, 0.0  ;;  %v1389_v28 = vmul.f32 -1.442695, %v279_v41 }
 0x117   :  { %v2196_v56 = vpop.eup %1592  ;;  %1618 = vrcp.f32 %v846_v49  ;;  %v936_v50 = vadd.f32 1.0, %v1591_v31  ;;  %v593_v49 = vadd.f32 %v2142_v11, %v2031_v18  ;;  %v1078_v5 = vmul.f32 %v1585_v27, %v2097_v6 }
 0x118   :  { %v614_v38 = vpop.f32.mrf.mxu1  ;;  %v2198_v21 = vpop.eup %1594  ;;  %1620 = vtanh.f32 %v587_v39  ;;  %v1061_v57 = vadd.f32 %v1045_v63, %v2375_v54  ;;  %1141 = vxpose.xlu1.b32.cont [2/16] %v1093_v13, 128  ;;  %v285_v24 = vadd.f32 %v2128_v2, %v2002_v51  ;;  %v603_v12 = vadd.f32 %v2168_v35, %v2002_v51 }
 0x119   :  { %v1597_v15 = vpop.eup %1596  ;;  %1622 = vrcp.f32 %v936_v50  ;;  %v1031_v44 = vmax.f32 %v725_v36, 0.0  ;;  %v730_v11 = vadd.f32 %v729_v9, %v2115_v8  ;;  %v2216_v39 = vpop.f32.mrf.mxu0  ;;  %v1094_v27 = vadd.f32 %v1078_v5, %v1030_v32 }
 0x11a   :  { %v2206_v19 = vpop.f32.mrf.mxu1  ;;  %v1599_v47 = vpop.eup %1598  ;;  %1624 = vpow2.f32 %v1388_v42  ;;  %1109 = vxpose.xlu0.b32.cont [2/16] %v1061_v57, 128  ;;  %v1046_v3 = vmul.f32 %v1597_v15, %v2067_v30  ;;  %v1399_v63 = vmul.f32 -1.442695, %v597_v26  ;;  %v599_v2 = vadd.f32 %v2158_v60, %v2031_v18 }
 0x11b   :  { %v2213_v48 = vpop.eup %1600  ;;  %1626 = vpow2.f32 %v1398_v58  ;;  %v609_v35 = vadd.f32 %v608_v43, %v2002_v51  ;;  %v1079_v30 = vmul.f32 %v1599_v47, %v2109_v29  ;;  %v1015_v50 = vmax.f32 %v2184_v52, 0.0  ;;  %v739_v13 = vpop.f32.mrf.mxu0 }
 0x11c   :  { %v620_v6 = vpop.f32.mrf.mxu1  ;;  %v1603_v41 = vpop.eup %1602  ;;  %1628 = vrcp.f32 %v847_v23  ;;  %v1062_v42 = vadd.f32 %v1046_v3, %v1014_v34  ;;  %1142 = vxpose.xlu1.b32.cont [3/16] %v1094_v27, 128  ;;  %v1400_v32 = vmul.f32 -1.442695, %v603_v12  ;;  %v735_v60 = vadd.f32 %v2180_v46, %v2115_v8 }
 0x11d   :  { %v2222_v55 = vpop.eup %1604  ;;  %v937_v31 = vadd.f32 1.0, %v1603_v41  ;;  %1630 = vtanh.f32 %v593_v49  ;;  %v605_v43 = vadd.f32 %v2176_v17, %v2031_v18  ;;  %v1032_v34 = vmax.f32 %v730_v11, 0.0 }
 0x11e   :  { %v2224_v58 = vpop.f32.mrf.mxu1  ;;  %v1607_v36 = vpop.eup %1606  ;;  %1632 = vpow2.f32 %v1389_v28  ;;  %1110 = vxpose.xlu0.b32.cont [3/16] %v1062_v42, 128  ;;  %v1095_v26 = vadd.f32 %v1079_v30, %v1031_v44  ;;  %v376_v52 = vadd.f32 %v2014_v0, %v2115_v8  ;;  %v1390_v54 = vmul.f32 -1.442695, %v285_v24 }
 0x11f   :  { %v2230_v9 = vpop.eup %1608  ;;  %1634 = vrcp.f32 %v937_v31  ;;  %v615_v57 = vadd.f32 %v614_v38, %v2002_v51  ;;  %v1401_v15 = vmul.f32 -1.442695, %v609_v35  ;;  %v1080_v49 = vmul.f32 %v1607_v36, %v2123_v59  ;;  %v1502_v44 = vpop.f32.mrf.mxu0 }
 0x120   :  { %v626_v23 = vpop.f32.mrf.mxu1  ;;  %v1611_v29 = vpop.eup %1610  ;;  %1636 = vpow2.f32 %v1399_v63  ;;  %1143 = vxpose.xlu1.b32.cont [4/16] %v1095_v26, 128  ;;  %v1033_v47 = vmax.f32 %v735_v60, 0.0  ;;  %v611_v0 = vadd.f32 %v2191_v25, %v2031_v18  ;;  %v740_v24 = vadd.f32 %v739_v13, %v2115_v8 }
 0x121   :  { %v1613_v46 = vpop.eup %1612  ;;  %1638 = vtanh.f32 %v599_v2  ;;  %v1047_v28 = vmul.f32 %v1611_v29, %v2070_v37  ;;  %v1096_v37 = vadd.f32 %v1080_v49, %v1032_v34  ;;  %v1402_v41 = vmul.f32 -1.442695, %v615_v57 }
 0x122   :  { %v2238_v17 = vpop.f32.mrf.mxu1  ;;  %v1615_v5 = vpop.eup %1614  ;;  %1640 = vpow2.f32 %v1400_v32  ;;  %v621_v59 = vadd.f32 %v620_v6, %v2002_v51  ;;  %v1016_v2 = vmax.f32 %v376_v52, 0.0  ;;  %v1081_v35 = vmul.f32 %v1613_v46, %v2148_v33 }
 0x123   :  { %v1617_v12 = vpop.eup %1616  ;;  %v938_v38 = vadd.f32 1.0, %v1615_v5  ;;  %1642 = vtanh.f32 %v605_v43  ;;  %v1063_v11 = vadd.f32 %v1047_v28, %v1015_v50  ;;  %v745_v42 = vadd.f32 %v2216_v39, %v2115_v8  ;;  %v749_v32 = vpop.f32.mrf.mxu0 }
 0x124   :  { %v632_v3 = vpop.f32.mrf.mxu1  ;;  %v2244_v27 = vpop.eup %1618  ;;  %1644 = vpow2.f32 %v1390_v54  ;;  %1144 = vxpose.xlu1.b32.cont [5/16] %v1096_v37, 128  ;;  %v617_v30 = vadd.f32 %v2206_v19, %v2031_v18  ;;  %v627_v36 = vadd.f32 %v626_v23, %v2002_v51  ;;  %v1034_v50 = vmax.f32 %v740_v24, 0.0 }
 0x125   :  { %v1621_v63 = vpop.eup %1620  ;;  %1646 = vrcp.f32 %v938_v38  ;;  %1111 = vxpose.xlu0.b32.cont [4/16] %v1063_v11, 128  ;;  %v1097_v43 = vadd.f32 %v1081_v35, %v1033_v47  ;;  %v381_v33 = vadd.f32 %v2012_v61, %v2115_v8  ;;  %v848_v13 = vadd.f32 1.0, %v1617_v12  ;;  %v1505_v49 = vpop.f32.mrf.mxu0 }
 0x126   :  { %v2247_v25 = vpop.f32.mrf.mxu1  ;;  %v1623_v31 = vpop.eup %1622  ;;  %1648 = vpow2.f32 %v1401_v15  ;;  %v1403_v26 = vmul.f32 -1.442695, %v621_v59  ;;  %v633_v23 = vadd.f32 %v632_v3, %v2002_v51  ;;  %v1082_v54 = vmul.f32 %v1621_v63, %v2174_v53 }
 0x127   :  { %v1625_v6 = vpop.eup %1624  ;;  %1650 = vtanh.f32 %v611_v0  ;;  %v1048_v60 = vmul.f32 %v1623_v31, %v2080_v45  ;;  %v1035_v45 = vmax.f32 %v745_v42, 0.0  ;;  %v750_v46 = vadd.f32 %v749_v32, %v2115_v8  ;;  %v759_v63 = vpop.f32.mrf.mxu0 }
 0x128   :  { %v1627_v34 = vpop.eup %1626  ;;  %1652 = vpow2.f32 %v1402_v41  ;;  %v638_v52 = vpop.f32.mrf.mxu1  ;;  %1145 = vxpose.xlu1.b32.cont [6/16] %v1097_v43, 128  ;;  %v1404_v15 = vmul.f32 -1.442695, %v627_v36  ;;  %v623_v28 = vadd.f32 %v2224_v58, %v2031_v18  ;;  %v1098_v5 = vadd.f32 %v1082_v54, %v1034_v50 }
 0x129   :  { %v2258_v39 = vpop.eup %1628  ;;  %v939_v29 = vadd.f32 1.0, %v1627_v34  ;;  %v1064_v19 = vadd.f32 %v1048_v60, %v1016_v2  ;;  %1654 = vtanh.f32 %v617_v30  ;;  %v1017_v24 = vmax.f32 %v381_v33, 0.0  ;;  %v1508_v34 = vpop.f32.mrf.mxu0 }
 0x12a   :  { %v1631_v57 = vpop.eup %1630  ;;  %v639_v53 = vadd.f32 %v638_v52, %v2002_v51  ;;  %v386_v38 = vadd.f32 %v2020_v7, %v2115_v8  ;;  %v1405_v11 = vmul.f32 -1.442695, %v633_v23  ;;  %v755_v41 = vadd.f32 %v1502_v44, %v2115_v8 }
 0x12b   :  { %v1633_v61 = vpop.eup %1632  ;;  %1656 = vrcp.f32 %v939_v29  ;;  %1112 = vxpose.xlu0.b32.cont [5/16] %v1064_v19, 128  ;;  %v1083_v47 = vmul.f32 %v1631_v57, %v2196_v56  ;;  %v1036_v59 = vmax.f32 %v750_v46, 0.0  ;;  %v629_v51 = vadd.f32 %v2238_v17, %v2031_v18  ;;  %v640_v19 = vpop.f32.mrf.mxu1 }
 0x12c   :  { %v1635_v0 = vpop.eup %1634  ;;  %1658 = vpow2.f32 %v1403_v26  ;;  %1146 = vxpose.xlu1.b32.cont [7/16] %v1098_v5, 128  ;;  %v1406_v42 = vmul.f32 -1.442695, %v639_v53  ;;  %v1018_v30 = vmax.f32 %v386_v38, 0.0  ;;  %v849_v36 = vadd.f32 1.0, %v1625_v6  ;;  %v769_v46 = vpop.f32.mrf.mxu0 }
 0x12d   :  { %v1637_v12 = vpop.eup %1636  ;;  %1660 = vrcp.f32 %v848_v13  ;;  %v1049_v3 = vmul.f32 %v1635_v0, %v2092_v1  ;;  %v1099_v35 = vadd.f32 %v1083_v47, %v1035_v45  ;;  %v1037_v32 = vmax.f32 %v755_v41, 0.0 }
 0x12e   :  { %v1639_v58 = vpop.eup %1638  ;;  %v940_v37 = vadd.f32 1.0, %v1637_v12  ;;  %1662 = vpow2.f32 %v1404_v15  ;;  %v760_v17 = vadd.f32 %v759_v63, %v2115_v8  ;;  %v635_v60 = vadd.f32 %v2247_v25, %v2031_v18 }
 0x12f   :  { %v1641_v56 = vpop.eup %1640  ;;  %1664 = vtanh.f32 %v623_v28  ;;  %v1065_v2 = vadd.f32 %v1049_v3, %v1017_v24  ;;  %v1084_v44 = vmul.f32 %v1639_v58, %v2213_v48  ;;  %v391_v48 = vadd.f32 %v2017_v4, %v2115_v8 }
 0x130   :  { %v1643_v7 = vpop.eup %1642  ;;  %1666 = vrcp.f32 %v940_v37  ;;  %v941_v31 = vadd.f32 1.0, %v1641_v56  ;;  %1147 = vxpose.xlu1.b32.cont [8/16] %v1099_v35, 128  ;;  %v269_v52 = vadd.f32 %v2088_v62, %v2031_v18  ;;  %v850_v25 = vadd.f32 1.0, %v1633_v61  ;;  %v2376_v35 = vld [vmem:[#allocation11_spill] sm:$0xff] }
 0x131   :  { %v1645_v1 = vpop.eup %1644  ;;  %1668 = vpow2.f32 %v1405_v11  ;;  %1113 = vxpose.xlu0.b32.cont [6/16] %v1065_v2, 128  ;;  %v1100_v13 = vadd.f32 %v1084_v44, %v1036_v59  ;;  %v1085_v6 = vmul.f32 %v1643_v7, %v2230_v9  ;;  %v765_v57 = vadd.f32 %v1505_v49, %v2115_v8  ;;  %v2377_v44 = vld [vmem:[#allocation10_spill] sm:$0xff] }
 0x132   :  { %v1647_v50 = vpop.eup %1646  ;;  %1670 = vrcp.f32 %v941_v31  ;;  %v1038_v9 = vmax.f32 %v760_v17, 0.0  ;;  %v641_v4 = vadd.f32 %v640_v19, %v2031_v18  ;;  %v1019_v62 = vmax.f32 %v391_v48, 0.0 }
 0x133   :  { %v1649_v43 = vpop.eup %1648  ;;  %1672 = vtanh.f32 %v629_v51  ;;  %v1050_v33 = vmul.f32 %v1647_v50, %v2100_v16  ;;  %v1101_v15 = vadd.f32 %v1085_v6, %v1037_v32  ;;  %v401_v61 = vadd.f32 %v2022_v10, %v2115_v8 }
 0x134   :  { %v1651_v26 = vpop.eup %1650  ;;  %v942_v29 = vadd.f32 1.0, %v1649_v43  ;;  %1674 = vpow2.f32 %v1406_v42  ;;  %1148 = vxpose.xlu1.b32.cont [9/16] %v1100_v13, 128  ;;  %v396_v49 = vadd.f32 %v2025_v14, %v2115_v8  ;;  %v851_v0 = vadd.f32 1.0, %v1645_v1 }
 0x135   :  { %v1653_v23 = vpop.eup %1652  ;;  %1676 = vrcp.f32 %v849_v36  ;;  %v1066_v54 = vadd.f32 %v1050_v33, %v1018_v30  ;;  %v1086_v28 = vmul.f32 %v1651_v26, %v2244_v27  ;;  %v1039_v38 = vmax.f32 %v765_v57, 0.0 }
 0x136   :  { %1678 = vrcp.f32 %v942_v29  ;;  %v943_v16 = vadd.f32 1.0, %v1653_v23  ;;  %v1655_v45 = vpop.eup %1654  ;;  %v770_v27 = vadd.f32 %v769_v46, %v2115_v8  ;;  %v275_v14 = vadd.f32 %v2105_v22, %v2031_v18 }
 0x137   :  { %1680 = vtanh.f32 %v635_v60  ;;  %1114 = vxpose.xlu0.b32.cont [7/16] %v1066_v54, 128  ;;  %v1102_v10 = vadd.f32 %v1086_v28, %v1038_v9  ;;  %v1087_v58 = vmul.f32 %v1655_v45, %v2258_v39  ;;  %v1021_v56 = vmax.f32 %v401_v61, 0.0  ;;  %v2378_v60 = vld [vmem:[#allocation13_spill] sm:$0xff] }
 0x138   :  { %v1657_v5 = vpop.eup %1656  ;;  %1682 = vrcp.f32 %v943_v16  ;;  %1149 = vxpose.xlu1.b32.cont [10/16] %v1101_v15, 128  ;;  %v1020_v51 = vmax.f32 %v396_v49, 0.0  ;;  %v406_v2 = vadd.f32 %v2033_v20, %v2115_v8  ;;  %v775_v39 = vadd.f32 %v1508_v34, %v2115_v8  ;;  %v2379_v34 = vld [vmem:[#allocation5_spill] sm:$0xff]  ;;  %v2380_v16 = vld [vmem:[#allocation12_spill] sm:$0xff] }
 0x139   :  { %v1659_v47 = vpop.eup %1658  ;;  %1684 = vrcp.f32 %v850_v25  ;;  %v1051_v24 = vmul.f32 %v1657_v5, %v2117_v40  ;;  %v1511_v40 = vpop.f32.mrf.mxu0  ;;  %v1040_v42 = vmax.f32 %v770_v27, 0.0  ;;  %v1103_v1 = vadd.f32 %v1087_v58, %v1039_v38 }
 0x13a   :  { %v1661_v53 = vpop.eup %1660  ;;  %1686 = vtanh.f32 %v269_v52  ;;  %v944_v12 = vadd.f32 1.0, %v1659_v47  ;;  %v281_v50 = vadd.f32 %v2377_v44, %v2031_v18  ;;  %v411_v13 = vadd.f32 %v2379_v34, %v2115_v8 }
 0x13b   :  { %v1663_v11 = vpop.eup %1662  ;;  %1688 = vtanh.f32 %v641_v4  ;;  %v1067_v3 = vadd.f32 %v1051_v24, %v1019_v62  ;;  %v779_v17 = vpop.f32.mrf.mxu0  ;;  %v1041_v29 = vmax.f32 %v775_v39, 0.0  ;;  %v1022_v54 = vmax.f32 %v406_v2, 0.0 }
 0x13c   :  { %v1665_v37 = vpop.eup %1664  ;;  %1690 = vrcp.f32 %v944_v12  ;;  %v945_v41 = vadd.f32 1.0, %v1663_v11  ;;  %1150 = vxpose.xlu1.b32.cont [11/16] %v1102_v10, 128  ;;  %v780_v19 = vadd.f32 %v779_v17, %v2115_v8  ;;  %v287_v57 = vadd.f32 %v2380_v16, %v2031_v18  ;;  %v2381_v18 = vld [vmem:[#allocation7_spill] sm:$0xff]  ;;  %v2382_v10 = vld [vmem:[#allocation6_spill] sm:$0xff] }
 0x13d   :  { %v1667_v59 = vpop.eup %1666  ;;  %1692 = vrcp.f32 %v851_v0  ;;  %1115 = vxpose.xlu0.b32.cont [8/16] %v1067_v3, 128  ;;  %v1088_v30 = vmul.f32 %v1665_v37, %v1661_v53  ;;  %v785_v5 = vadd.f32 %v1511_v40, %v2115_v8  ;;  %v1023_v0 = vmax.f32 %v411_v13, 0.0 }
 0x13e   :  { %v1669_v63 = vpop.eup %1668  ;;  %1694 = vrcp.f32 %v945_v41  ;;  %v1052_v7 = vmul.f32 %v1667_v59, %v2376_v35  ;;  %v1042_v62 = vmax.f32 %v780_v19, 0.0  ;;  %v416_v24 = vadd.f32 %v2381_v18, %v2115_v8 }
 0x13f   :  { %v1671_v31 = vpop.eup %1670  ;;  %v946_v22 = vadd.f32 1.0, %v1669_v63  ;;  %1696 = vtanh.f32 %v275_v14  ;;  %v1104_v23 = vadd.f32 %v1088_v30, %v1040_v42  ;;  %v421_v58 = vadd.f32 %v2382_v10, %v2115_v8  ;;  %v2383_v63 = vld [vmem:[#allocation9_spill] sm:$0xff] }
 0x140   :  { %v1673_v36 = vpop.eup %1672  ;;  %v1068_v32 = vadd.f32 %v1052_v7, %v1020_v51  ;;  %v1053_v43 = vmul.f32 %v1671_v31, %v2378_v60  ;;  %1151 = vxpose.xlu1.b32.cont [12/16] %v1103_v1, 128  ;;  %v1024_v37 = vmax.f32 %v416_v24, 0.0  ;;  %v426_v2 = vadd.f32 %v2383_v63, %v2115_v8 }
 0x141   :  { %v1675_v20 = vpop.eup %1674  ;;  %1698 = vrcp.f32 %v946_v22  ;;  %v1025_v51 = vmax.f32 %v421_v58, 0.0  ;;  %v2384_v22 = vld [vmem:[#allocation8_spill] sm:$0xff] }
 0x142   :  { %v1677_v33 = vpop.eup %1676  ;;  %v947_v6 = vadd.f32 1.0, %v1675_v20  ;;  %1116 = vxpose.xlu0.b32.cont [9/16] %v1068_v32, 128  ;;  %v1069_v26 = vadd.f32 %v1053_v43, %v1021_v56  ;;  %1700 = vtanh.f32 %v281_v50  ;;  %v431_v42 = vadd.f32 %v2384_v22, %v2115_v8 }
 0x143   :  { %v1679_v48 = vpop.eup %1678  ;;  %v1089_v52 = vmul.f32 %v1677_v33, %v1673_v36  ;;  %v1026_v1 = vmax.f32 %v426_v2, 0.0 }
 0x144   :  { %v1681_v25 = vpop.eup %1680  ;;  %v1054_v9 = vmul.f32 %v1679_v48, %v2198_v21  ;;  %1152 = vxpose.xlu1.b32.cont [13/16] %v1104_v23, 128  ;;  %1702 = vrcp.f32 %v947_v6  ;;  %v1027_v50 = vmax.f32 %v431_v42, 0.0 }
 0x145   :  { %v1683_v45 = vpop.eup %1682  ;;  %v1105_v61 = vadd.f32 %v1089_v52, %v1041_v29  ;;  %1704 = vtanh.f32 %v287_v57 }
 0x146   :  { %v1685_v4 = vpop.eup %1684  ;;  %1117 = vxpose.xlu0.b32.cont [10/16] %v1069_v26, 128  ;;  %v1070_v46 = vadd.f32 %v1054_v9, %v1022_v54  ;;  %v1055_v15 = vmul.f32 %v1683_v45, %v2222_v55  ;;  %v1043_v55 = vmax.f32 %v785_v5, 0.0 }
 0x147   :  { %v1687_v28 = vpop.eup %1686  ;;  %v1090_v47 = vmul.f32 %v1685_v4, %v1681_v25 }
 0x148   :  { %v1689_v49 = vpop.eup %1688  ;;  %1153 = vxpose.xlu1.b32.cont [14/16] %v1105_v61, 128  ;;  %v1071_v12 = vadd.f32 %v1055_v15, %v1023_v0 }
 0x149   :  { %v1691_v21 = vpop.eup %1690  ;;  %v1106_v11 = vadd.f32 %v1090_v47, %v1042_v62 }
 0x14a   :  { %v1693_v53 = vpop.eup %1692  ;;  %1118 = vxpose.xlu0.b32.cont [11/16] %v1070_v46, 128  ;;  %v1056_v38 = vmul.f32 %v1691_v21, %v1687_v28 }
 0x14b   :  { %v1695_v27 = vpop.eup %1694  ;;  %v1091_v3 = vmul.f32 %v1693_v53, %v1689_v49 }
 0x14c   :  { %v1697_v14 = vpop.eup %1696  ;;  %1154 = vxpose.xlu1.b32.cont [15/16] %v1106_v11, 128  ;;  %v1072_v41 = vadd.f32 %v1056_v38, %v1024_v37 }
 0x14d   :  { %v1057_v40 = vmul.f32 %v1697_v14, %v1695_v27  ;;  %v1107_v56 = vadd.f32 %v1091_v3, %v1043_v55 }
 0x14e   :  { %1119 = vxpose.xlu0.b32.cont [12/16] %v1071_v12, 128  ;;  %v1699_v59 = vpop.eup %1698 }
 0x14f   :  { %v1701_v39 = vpop.eup %1700  ;;  %v1073_v35 = vadd.f32 %v1057_v40, %v1025_v51 }
 0x150   :  { %1155 = vxpose.xlu1.b32.end [16/16] %v1107_v56, 128  ;;  %v1058_v7 = vmul.f32 %v1701_v39, %v1699_v59 }
 0x151   :  { %v1703_v31 = vpop.eup %1702 }
 0x152   :  { %1120 = vxpose.xlu0.b32.cont [13/16] %v1072_v41, 128  ;;  %v1705_v30 = vpop.eup %1704  ;;  %v1074_v36 = vadd.f32 %v1058_v7, %v1026_v1 }
 0x153   :  { %v1059_v44 = vmul.f32 %v1705_v30, %v1703_v31 }
 0x155   :  { %v1075_v32 = vadd.f32 %v1059_v44, %v1027_v50 }
 0x156   :  { %1121 = vxpose.xlu0.b32.cont [14/16] %v1073_v35, 128 }
 0x15a   :  { %1122 = vxpose.xlu0.b32.cont [15/16] %v1074_v36, 128 }
 0x15e   :  { %1123 = vxpose.xlu0.b32.end [16/16] %v1075_v32, 128 }
 0x190   :  { %v1156_v17 = vpop.trf.xlu1 }
 0x191   :  { %v1246_v25 = vmul.f32 %v1156_v17, %v1156_v17 }
 0x194   :  { %v1157_v60 = vpop.trf.xlu1 }
 0x195   :  { %v1247_v23 = vmul.f32 %v1157_v60, %v1157_v60 }
 0x197   :  { %v1262_v57 = vadd.f32 %v1247_v23, %v1246_v25 }
 0x198   :  { %v1158_v43 = vpop.trf.xlu1 }
 0x199   :  { %v1248_v54 = vmul.f32 %v1158_v43, %v1158_v43 }
 0x19b   :  { %v1263_v4 = vadd.f32 %v1262_v57, %v1248_v54 }
 0x19c   :  { %v1159_v20 = vpop.trf.xlu1 }
 0x19d   :  { %v1249_v9 = vmul.f32 %v1159_v20, %v1159_v20 }
 0x19e   :  { %v1124_v33 = vpop.trf.xlu0 }
 0x19f   :  { %v1264_v28 = vadd.f32 %v1263_v4, %v1249_v9  ;;  %v1209_v27 = vmul.f32 %v1124_v33, %v1124_v33  ;;  %v1172_v56 = vmul.f32 %v1156_v17, %v1124_v33 }
 0x1a0   :  { %v1160_v34 = vpop.trf.xlu1 }
 0x1a1   :  { %v1250_v46 = vmul.f32 %v1160_v34, %v1160_v34 }
 0x1a2   :  { %v1125_v13 = vpop.trf.xlu0 }
 0x1a3   :  { %v1265_v61 = vadd.f32 %v1264_v28, %v1250_v46  ;;  %v1210_v24 = vmul.f32 %v1125_v13, %v1125_v13  ;;  %v1173_v58 = vmul.f32 %v1157_v60, %v1125_v13 }
 0x1a4   :  { %v2318_v6 = vpop.trf.xlu1 }
 0x1a5   :  { %v1251_v5 = vmul.f32 %v2318_v6, %v2318_v6  ;;  %v1225_v10 = vadd.f32 %v1210_v24, %v1209_v27  ;;  %v1188_v7 = vadd.f32 %v1173_v58, %v1172_v56 }
 0x1a6   :  { %v1126_v26 = vpop.trf.xlu0 }
 0x1a7   :  { %v1266_v0 = vadd.f32 %v1265_v61, %v1251_v5  ;;  %v1211_v55 = vmul.f32 %v1126_v26, %v1126_v26  ;;  %v1174_v63 = vmul.f32 %v1158_v43, %v1126_v26 }
 0x1a8   :  { %v2320_v8 = vpop.trf.xlu1 }
 0x1a9   :  { %v1252_v47 = vmul.f32 %v2320_v8, %v2320_v8  ;;  %v1226_v51 = vadd.f32 %v1225_v10, %v1211_v55  ;;  %v1189_v50 = vadd.f32 %v1188_v7, %v1174_v63 }
 0x1aa   :  { %v1127_v48 = vpop.trf.xlu0 }
 0x1ab   :  { %v1267_v53 = vadd.f32 %v1266_v0, %v1252_v47  ;;  %v1212_v37 = vmul.f32 %v1127_v48, %v1127_v48  ;;  %v1175_v22 = vmul.f32 %v1159_v20, %v1127_v48 }
 0x1ac   :  { %v2322_v29 = vpop.trf.xlu1 }
 0x1ad   :  { %v1253_v18 = vmul.f32 %v2322_v29, %v2322_v29  ;;  %v1227_v31 = vadd.f32 %v1226_v51, %v1212_v37  ;;  %v1190_v13 = vadd.f32 %v1189_v50, %v1175_v22 }
 0x1ae   :  { %v1128_v19 = vpop.trf.xlu0 }
 0x1af   :  { %v1268_v11 = vadd.f32 %v1267_v53, %v1253_v18  ;;  %v1213_v2 = vmul.f32 %v1128_v19, %v1128_v19  ;;  %v1176_v17 = vmul.f32 %v1160_v34, %v1128_v19 }
 0x1b0   :  { %v2324_v52 = vpop.trf.xlu1 }
 0x1b1   :  { %v1254_v38 = vmul.f32 %v2324_v52, %v2324_v52  ;;  %v1228_v32 = vadd.f32 %v1227_v31, %v1213_v2  ;;  %v1191_v9 = vadd.f32 %v1190_v13, %v1176_v17 }
 0x1b2   :  { %v1129_v16 = vpop.trf.xlu0 }
 0x1b3   :  { %v1269_v41 = vadd.f32 %v1268_v11, %v1254_v38  ;;  %v1214_v42 = vmul.f32 %v1129_v16, %v1129_v16  ;;  %v1177_v23 = vmul.f32 %v2318_v6, %v1129_v16 }
 0x1b4   :  { %v2326_v45 = vpop.trf.xlu1 }
 0x1b5   :  { %v1255_v3 = vmul.f32 %v2326_v45, %v2326_v45  ;;  %v1229_v26 = vadd.f32 %v1228_v32, %v1214_v42  ;;  %v1192_v61 = vadd.f32 %v1191_v9, %v1177_v23 }
 0x1b6   :  { %v1130_v15 = vpop.trf.xlu0 }
 0x1b7   :  { %v1270_v39 = vadd.f32 %v1269_v41, %v1255_v3  ;;  %v1215_v60 = vmul.f32 %v1130_v15, %v1130_v15  ;;  %v1178_v46 = vmul.f32 %v2320_v8, %v1130_v15 }
 0x1b8   :  { %v2330_v62 = vpop.trf.xlu1 }
 0x1b9   :  { %v1256_v59 = vmul.f32 %v2330_v62, %v2330_v62  ;;  %v1230_v4 = vadd.f32 %v1229_v26, %v1215_v60  ;;  %v1193_v16 = vadd.f32 %v1192_v61, %v1178_v46 }
 0x1ba   :  { %v1131_v49 = vpop.trf.xlu0 }
 0x1bb   :  { %v1271_v36 = vadd.f32 %v1270_v39, %v1256_v59  ;;  %v1216_v25 = vmul.f32 %v1131_v49, %v1131_v49  ;;  %v1179_v19 = vmul.f32 %v2322_v29, %v1131_v49 }
 0x1bc   :  { %v2336_v21 = vpop.trf.xlu1 }
 0x1bd   :  { %v1257_v35 = vmul.f32 %v2336_v21, %v2336_v21  ;;  %v1231_v34 = vadd.f32 %v1230_v4, %v1216_v25  ;;  %v1194_v11 = vadd.f32 %v1193_v16, %v1179_v19 }
 0x1be   :  { %v1132_v12 = vpop.trf.xlu0 }
 0x1bf   :  { %v1272_v43 = vadd.f32 %v1271_v36, %v1257_v35  ;;  %v1217_v28 = vmul.f32 %v1132_v12, %v1132_v12  ;;  %v1180_v38 = vmul.f32 %v2324_v52, %v1132_v12 }
 0x1c0   :  { %v2342_v14 = vpop.trf.xlu1 }
 0x1c1   :  { %v1258_v44 = vmul.f32 %v2342_v14, %v2342_v14  ;;  %v1232_v53 = vadd.f32 %v1231_v34, %v1217_v28  ;;  %v1195_v37 = vadd.f32 %v1194_v11, %v1180_v38 }
 0x1c2   :  { %v1133_v40 = vpop.trf.xlu0 }
 0x1c3   :  { %v1273_v48 = vadd.f32 %v1272_v43, %v1258_v44  ;;  %v1218_v47 = vmul.f32 %v1133_v40, %v1133_v40  ;;  %v1181_v8 = vmul.f32 %v2326_v45, %v1133_v40 }
 0x1c4   :  { %v1169_v1 = vpop.trf.xlu1 }
 0x1c5   :  { %v1259_v33 = vmul.f32 %v1169_v1, %v1169_v1  ;;  %v1233_v3 = vadd.f32 %v1232_v53, %v1218_v47  ;;  %v1196_v56 = vadd.f32 %v1195_v37, %v1181_v8 }
 0x1c6   :  { %v1134_v30 = vpop.trf.xlu0 }
 0x1c7   :  { %v1274_v5 = vadd.f32 %v1273_v48, %v1259_v33  ;;  %v1219_v27 = vmul.f32 %v1134_v30, %v1134_v30  ;;  %v1182_v49 = vmul.f32 %v2330_v62, %v1134_v30 }
 0x1c8   :  { %v1170_v54 = vpop.trf.xlu1 }
 0x1c9   :  { %v1260_v57 = vmul.f32 %v1170_v54, %v1170_v54  ;;  %v1234_v29 = vadd.f32 %v1233_v3, %v1219_v27  ;;  %v1197_v2 = vadd.f32 %v1196_v56, %v1182_v49 }
 0x1ca   :  { %v1135_v20 = vpop.trf.xlu0 }
 0x1cb   :  { %v1275_v24 = vadd.f32 %v1274_v5, %v1260_v57  ;;  %v1220_v15 = vmul.f32 %v1135_v20, %v1135_v20  ;;  %v1183_v63 = vmul.f32 %v2336_v21, %v1135_v20 }
 0x1cc   :  { %v1171_v0 = vpop.trf.xlu1 }
 0x1cd   :  { %v1261_v6 = vmul.f32 %v1171_v0, %v1171_v0  ;;  %v1235_v51 = vadd.f32 %v1234_v29, %v1220_v15  ;;  %v1198_v7 = vadd.f32 %v1197_v2, %v1183_v63 }
 0x1ce   :  { %v1136_v18 = vpop.trf.xlu0 }
 0x1cf   :  { %v1276_v55 = vadd.f32 %v1275_v24, %v1261_v6  ;;  %v1221_v41 = vmul.f32 %v1136_v18, %v1136_v18  ;;  %v1184_v35 = vmul.f32 %v2342_v14, %v1136_v18 }
 0x1d1   :  { %v1277_v58 = vrot.slane %v1276_v55, 4  ;;  %v1236_v39 = vadd.f32 %v1235_v51, %v1221_v41  ;;  %v1199_v36 = vadd.f32 %v1198_v7, %v1184_v35 }
 0x1d2   :  { %v1137_v10 = vpop.trf.xlu0 }
 0x1d3   :  { %v1278_v59 = vadd.f32 %v1277_v58, %v1276_v55  ;;  %v1222_v52 = vmul.f32 %v1137_v10, %v1137_v10  ;;  %v1185_v22 = vmul.f32 %v1169_v1, %v1137_v10 }
 0x1d5   :  { %v1279_v40 = vrot.slane %v1278_v59, 2  ;;  %v1237_v31 = vadd.f32 %v1236_v39, %v1222_v52  ;;  %v1200_v32 = vadd.f32 %v1199_v36, %v1185_v22 }
 0x1d6   :  { %v1138_v12 = vpop.trf.xlu0 }
 0x1d7   :  { %v1223_v45 = vmul.f32 %v1138_v12, %v1138_v12  ;;  %v1186_v30 = vmul.f32 %v1170_v54, %v1138_v12  ;;  %v1280_v50 = vadd.f32 %v1279_v40, %v1278_v59 }
 0x1d9   :  { %v1238_v62 = vadd.f32 %v1237_v31, %v1223_v45  ;;  %v1201_v60 = vadd.f32 %v1200_v32, %v1186_v30  ;;  %v1281_v33 = vrot.slane %v1280_v50, 1 }
 0x1da   :  { %v1139_v42 = vpop.trf.xlu0 }
 0x1db   :  { %v1224_v44 = vmul.f32 %v1139_v42, %v1139_v42  ;;  %v1187_v21 = vmul.f32 %v1171_v0, %v1139_v42  ;;  %v1282_v23 = vadd.f32 %v1281_v33, %v1280_v50 }
 0x1dd   :  { %v1239_v17 = vadd.f32 %v1238_v62, %v1224_v44  ;;  %v1202_v26 = vadd.f32 %v1201_v60, %v1187_v21  ;;  %v1286_v1 = vmax.f32 %v1282_v23, 1e-24 }
 0x1df   :  { %v1240_v43 = vrot.slane %v1239_v17, 4  ;;  %v1203_v20 = vrot.slane %v1202_v26, 4  ;;  %1706 = vrsqrt.f32 %v1286_v1 }
 0x1e1   :  { %v1241_v13 = vadd.f32 %v1240_v43, %v1239_v17  ;;  %v1204_v9 = vadd.f32 %v1203_v20, %v1202_v26 }
 0x1e3   :  { %v1242_v14 = vrot.slane %v1241_v13, 2  ;;  %v1205_v54 = vrot.slane %v1204_v9, 2 }
 0x1e5   :  { %v1243_v25 = vadd.f32 %v1242_v14, %v1241_v13  ;;  %v1206_v46 = vadd.f32 %v1205_v54, %v1204_v9 }
 0x1e7   :  { %v1244_v48 = vrot.slane %v1243_v25, 1  ;;  %v1207_v28 = vrot.slane %v1206_v46, 1 }
 0x1e9   :  { %v1245_v57 = vadd.f32 %v1244_v48, %v1243_v25  ;;  %v1208_v61 = vadd.f32 %v1207_v28, %v1206_v46 }
 0x1eb   :  { %v1283_v4 = vmax.f32 %v1245_v57, 1e-24 }
 0x1ec   :  { %v1707_v5 = vpop.eup %1706 }
 0x1ed   :  { %1708 = vrsqrt.f32 %v1283_v4 }
 0x1fa   :  { %v1709_v34 = vpop.eup %1708 }
 0x1fb   :  { %v1285_v19 = vmul.f32 %v1709_v34, %v1208_v61 }
 0x1fd   :  { %v1288_v47 = vmul.f32 %v1707_v5, %v1285_v19 }
 0x1ff   :  { %v1407_v0 = vmul.f32 -0.088388346, %v1288_v47 }
 0x201   :  { %v1291_v18 = vmul.f32 1.442695, %v1407_v0 }
 0x203   :  { %1710 = vpow2.f32 %v1291_v18 }
 0x210   :  { %v1711_v24 = vpop.eup %1710 }
 0x211   :  { %v1293_v6 = vadd.f32 1.0, %v1711_v24 }
 0x213   :  { %1712 = vrcp.f32 %v1293_v6 }
 0x220   :  { %v1713_v16 = vpop.eup %1712 }
 0x221   :  { %1296 = vst [vmem:[#allocation2] sm:$0x1] %v1713_v16 }
 0x222   :  { %1725 = shalt.err (!%p1722_p4)
}
 0x223   :  { %1306 = dma.vmem_to_hbm [thread:$0]  %s1304_s3, 16, %s2365_s4, [#allocation3]  }
 0x224   :  { %1734 = dma.done.wait [#allocation3], 16  }
 0x225   :  { %1735 = vsyncadd [#allocation3], 4294967280 }
 0x226   :  { %1310 = vsyncpa [#allocation3], 1 }

</bundles_post_ra>
